<compile_context>
chip_gen: v7x
topology: tpu7x:2x2x1
jax: 0.10.0
libtpu: 0.0.40
codegen_flags: <defaults>
</compile_context>

<pallas_src>
import functools

import jax
import jax.numpy as jnp
from jax.experimental import pallas as pl
from jax.experimental.pallas import tpu as pltpu


def _plus_one_kernel(a_ref, b_ref):
    # Single VPU add, single store.
    b_ref[...] = a_ref[...] + jnp.float32(1.0)


@functools.partial(jax.jit)
def minues_ones(a: jax.Array, b: jax.Array):
    """Returns (b_updated, result) matching MinuesOnes.forward((a, b)).

    `b` is accepted only to mirror the torch call signature; the engine fully
    overwrites it (b = a + 1) without reading it, so it is not passed to the kernel.
    JAX arrays are immutable, so the in-place mutation is mirrored by returning
    the updated value (HBM buffer aliased to the input via input_output_aliases).
    """
    assert a.shape == (8,) and a.dtype == jnp.float32
    assert b.shape == (8,) and b.dtype == jnp.float32
    del b  # dead: fully overwritten by the engine, never read

    # Present the length-8 vector as a (1, 8) tile (data axis -> lanes). Lane-dense
    # padding to 128 is irrelevant at this size.
    a2 = a.reshape(1, 8)

    b_new = pl.pallas_call(
        _plus_one_kernel,
        out_shape=jax.ShapeDtypeStruct((1, 8), jnp.float32),
        in_specs=[pl.BlockSpec(memory_space=pltpu.VMEM)],
        out_specs=pl.BlockSpec(memory_space=pltpu.VMEM),
        input_output_aliases={0: 0},  # output reuses a's HBM buffer (in-place contract)
    )(a2)

    b_updated = b_new.reshape(8)
    # Module return value: same f32 subtract as torch/TVM would do -> bit-exact,
    # and it fuses into a single XLA elementwise op under jit.
    y = b_updated - jnp.float32(1.0)
    return b_updated, y


if __name__ == "__main__":
    key = jax.random.PRNGKey(0)
    ka, kb = jax.random.split(key)
    a = jax.random.normal(ka, (8,), dtype=jnp.float32)
    b = jax.random.normal(kb, (8,), dtype=jnp.float32)  # overwritten by the engine

    b_updated, result = minues_ones(a, b)
    jax.block_until_ready((b_updated, result))

    # Reference: engine writes b = a + 1, module returns b - 1 == (a + 1) - 1.
    ref_b = a + jnp.float32(1.0)
    ref_y = ref_b - jnp.float32(1.0)
    assert jnp.allclose(b_updated, ref_b, atol=0.0)
    assert jnp.allclose(result, ref_y, atol=0.0)

    print("KERNEL_OK")
</pallas_src>

<mosaic_0001>
module attributes {stable_mosaic.version = 11 : i64} {
  func.func @_plus_one_kernel(%arg0: memref<1x8xf32, #tpu.memory_space<vmem>>, %arg1: memref<1x8xf32, #tpu.memory_space<vmem>>) attributes {dimension_semantics = [], scalar_prefetch = 0 : i64, scratch_operands = 0 : i64, tpu.core_type = #tpu.core_type<tc>} {
    %c0 = arith.constant 0 : index
    %c0_0 = arith.constant 0 : index
    %0 = vector.load %arg0[%c0, %c0_0] : memref<1x8xf32, #tpu.memory_space<vmem>>, vector<1x8xf32>
    %cst = arith.constant 1.000000e+00 : f32
    %1 = vector.broadcast %cst : f32 to vector<1x8xf32>
    %2 = arith.addf %0, %1 : vector<1x8xf32>
    %c0_1 = arith.constant 0 : index
    %c0_2 = arith.constant 0 : index
    %3 = vector.load %arg1[%c0_1, %c0_2] : memref<1x8xf32, #tpu.memory_space<vmem>>, vector<1x8xf32>
    tpu.vector_store %arg1[%c0_1, %c0_2], %2 {strides = array<i32>} : memref<1x8xf32, #tpu.memory_space<vmem>>, vector<1x8xf32>,
    return
  }
}

</mosaic_0001>

<bundles_post_ra>
// kernel: minues_ones.1
= control target key start
LH: loop header
LB: loop body
LE: loop exit
PB: predicated region body
PF: predicated region fallthrough
CT: control target
= control target key end

     0   :  { %vm10_vm0 = vcmask 57344   ;;  %s32_s0 = inlined_call_operand.vmem [shape: f32[1,8], index: 0, kind: input, shape index: {}, may-alias: {0,1}]   ;;  %s33_s1 = inlined_call_operand.vmem [shape: f32[1,8], index: 1, kind: output, shape index: {}, may-alias: {0,1}]  }
   0x1   :  { %v8_v0 = vld [vmem:[%s32_s0] sm:$0x1] }
   0x2   :  { %v9_v1 = vadd.f32 1.0, %v8_v0 }
   0x4   :  { %11 = vst.msk [vmem:[%s33_s1] sm:$0x1] %vm10_vm0, %v9_v1 }

</bundles_post_ra>
